<compile_context>
chip_gen: v7x
topology: tpu7x:2x2x1
jax: 0.10.0
libtpu: 0.0.40
codegen_flags: <defaults>
</compile_context>

<pallas_src>
import math
import functools

import jax
import jax.numpy as jnp
from jax.experimental import pallas as pl
from jax.experimental.pallas import tpu as pltpu


# ---------------------------------------------------------------------------
# Pallas kernel: one grid step processes one batch element's (S, D) row slab
# ---------------------------------------------------------------------------
def attention_kernel(x_ref, wqkv_ref, bqkv_ref, wo_ref, pv_ref, out_ref,
                     o_scratch, *, head):
    S, D = x_ref.shape
    ah = D // head

    x = x_ref[...].astype(jnp.float32)                     # (S, D) f32 (for residual/LN)
    x_bf = x.astype(jnp.bfloat16)

    # --- Fused Q/K/V projection: one lane-dense (S, D) @ (D, 3D) MXU push -----------
    qkv = jnp.dot(x_bf, wqkv_ref[...],                     # bf16 x bf16 -> f32 acc
                  preferred_element_type=jnp.float32)
    qkv = qkv + bqkv_ref[...]                              # (S, 3D); q pre-scaled by 1/sqrt(ah)

    q = qkv[:, 0:D].astype(jnp.bfloat16)
    k = qkv[:, D:2 * D].astype(jnp.bfloat16)
    v = qkv[:, 2 * D:3 * D].astype(jnp.bfloat16)

    # --- Per-head softmax attention (small static head count) -----------------------
    for h in range(head):
        sl = slice(h * ah, (h + 1) * ah)
        qh, kh, vh = q[:, sl], k[:, sl], v[:, sl]
        # contract last dims directly ('qd,kd->qk'): no materialized K^T
        s = jax.lax.dot_general(qh, kh, (((1,), (1,)), ((), ())),
                                preferred_element_type=jnp.float32)     # (S, S)
        s = s - jnp.max(s, axis=-1, keepdims=True)
        p = jnp.exp(s)
        p = p * pl.reciprocal(jnp.sum(p, axis=-1, keepdims=True), approx=True)
        # dropout(A): identity in eval mode
        oh = jnp.dot(p.astype(jnp.bfloat16), vh,
                     preferred_element_type=jnp.float32)                # (S, ah)
        o_scratch[:, sl] = oh.astype(o_scratch.dtype)

    # --- Output projection (single (S,D)@(D,D)) + bias + residual + LayerNorm -------
    attn = jnp.dot(o_scratch[...], wo_ref[...],
                   preferred_element_type=jnp.float32)
    attn = attn + pv_ref[0:1, :]                           # + bo (dropout: identity)
    y = attn + x                                           # residual

    u = jnp.mean(y, axis=-1, keepdims=True)
    var = jnp.mean((y - u) ** 2, axis=-1, keepdims=True)
    out = pv_ref[1:2, :] * ((y - u) * jax.lax.rsqrt(var + 1e-12)) + pv_ref[2:3, :]

    out_ref[...] = out.astype(out_ref.dtype)


# ---------------------------------------------------------------------------
# Wrapper: parameter re-layout (free, outside the kernel) + pallas_call
# ---------------------------------------------------------------------------
def attention_forward(x, params, head):
    B, S, D = x.shape
    ah = D // head
    scale = 1.0 / math.sqrt(ah)

    # Fold the attention scale into the Q projection (free).
    wq = params["wq"] * scale
    bq = params["bq"] * scale

    # Fused, lane-dense QKV weight/bias packing; MXU weights stored as bf16.
    wqkv = jnp.concatenate([wq, params["wk"], params["wv"]], axis=1).astype(jnp.bfloat16)  # (D, 3D)
    bqkv = jnp.concatenate([bq, params["bk"], params["bv"]], axis=1)                        # (1, 3D) f32
    wo_bf = params["wo"].astype(jnp.bfloat16)                                               # (D, D)
    pvec = jnp.concatenate([params["bo"], params["g"], params["be"]], axis=0)               # (3, D) f32

    # Fold batch into the row axis; grid steps pick (S, D) slabs per batch element.
    x2d = x.reshape(B * S, D)
    M = B * S

    flops = 8 * M * D * D + 4 * B * head * S * S * ah
    transcendentals = B * head * S * S + B * head * S + M
    bytes_accessed = int(4 * x2d.size + 2 * wqkv.size + 4 * bqkv.size
                         + 2 * wo_bf.size + 4 * pvec.size + 4 * M * D)

    kernel = functools.partial(attention_kernel, head=head)

    grid_spec = pltpu.PrefetchScalarGridSpec(
        num_scalar_prefetch=0,
        grid=(B,),
        in_specs=[
            pl.BlockSpec((S, D), lambda b: (b, 0)),          # x rows for batch b
            pl.BlockSpec((D, 3 * D), lambda b: (0, 0)),      # fused QKV weights (resident)
            pl.BlockSpec((1, 3 * D), lambda b: (0, 0)),      # fused QKV biases
            pl.BlockSpec((D, D), lambda b: (0, 0)),          # output projection
            pl.BlockSpec((3, D), lambda b: (0, 0)),          # [bo; gamma; beta]
        ],
        out_specs=pl.BlockSpec((S, D), lambda b: (b, 0)),
        scratch_shapes=[pltpu.VMEM((S, D), jnp.bfloat16)],   # per-step head-concat buffer
    )

    out2d = pl.pallas_call(
        kernel,
        out_shape=jax.ShapeDtypeStruct((M, D), x.dtype),
        grid_spec=grid_spec,
        compiler_params=pltpu.CompilerParams(
            dimension_semantics=("parallel",),               # batch axis -> both TCs on v7x
            vmem_limit_bytes=32 * 1024 * 1024,               # safe headroom on v5e/v6e/v7x
        ),
        cost_estimate=pl.CostEstimate(flops=flops,
                                      transcendentals=transcendentals,
                                      bytes_accessed=bytes_accessed),
    )(x2d, wqkv, bqkv, wo_bf, pvec)
    return out2d.reshape(B, S, D)


# ---------------------------------------------------------------------------
# Pure-JAX reference (mirrors the PyTorch Attention forward, eval mode)
# ---------------------------------------------------------------------------
def attention_reference(x, params, head):
    B, S, D = x.shape
    ah = D // head
    q = x @ params["wq"] + params["bq"]
    k = x @ params["wk"] + params["bk"]
    v = x @ params["wv"] + params["bv"]
    tr = lambda t: t.reshape(B, S, head, ah).transpose(0, 2, 1, 3)
    q, k, v = tr(q), tr(k), tr(v)
    a = jnp.einsum("bhqa,bhka->bhqk", q, k) / math.sqrt(ah)
    a = jax.nn.softmax(a, axis=-1)
    o = jnp.einsum("bhqk,bhka->bhqa", a, v).transpose(0, 2, 1, 3).reshape(B, S, D)
    attn = o @ params["wo"] + params["bo"]
    y = attn + x
    u = jnp.mean(y, axis=-1, keepdims=True)
    s = jnp.mean((y - u) ** 2, axis=-1, keepdims=True)
    return params["g"] * ((y - u) / jnp.sqrt(s + 1e-12)) + params["be"]


# ---------------------------------------------------------------------------
# Main
# ---------------------------------------------------------------------------
if __name__ == "__main__":
    B, S = 2, 8
    SIZE, HEAD = 32, 4          # AHEAD = 8; DROPOUT inactive (eval mode)
    dtype = jnp.float32

    key = jax.random.PRNGKey(0)
    ks = jax.random.split(key, 10)

    def lin(kw, kb, din, dout):
        # deterministic init; stored as (in, out) so math is `x @ W + b`
        w = jax.random.normal(kw, (din, dout), dtype) * 0.05
        b = jax.random.normal(kb, (1, dout), dtype) * 0.01
        return w, b

    wq, bq = lin(ks[0], ks[1], SIZE, SIZE)
    wk, bk = lin(ks[2], ks[3], SIZE, SIZE)
    wv, bv = lin(ks[4], ks[5], SIZE, SIZE)
    wo, bo = lin(ks[6], ks[7], SIZE, SIZE)

    params = dict(
        wq=wq, bq=bq, wk=wk, bk=bk, wv=wv, bv=bv, wo=wo, bo=bo,
        g=jnp.ones((1, SIZE), dtype), be=jnp.zeros((1, SIZE), dtype),
    )

    x = jax.random.normal(ks[8], (B, S, SIZE), dtype)

    out = attention_forward(x, params, HEAD)
    out = jax.block_until_ready(out)

    ref = attention_reference(x, params, HEAD)
    assert out.shape == (B, S, SIZE)
    # tolerance accounts for bf16 MXU operands + the approx (EUP) softmax reciprocal
    assert jnp.allclose(out, ref, atol=2e-2, rtol=2e-2), "mismatch vs reference"

    print("KERNEL_OK")
</pallas_src>

<mosaic_0001>
module attributes {stable_mosaic.version = 11 : i64} {
  func.func @attention_kernel(%arg0: i32, %arg1: memref<8x32xf32, #tpu.memory_space<vmem>>, %arg2: memref<32x96xbf16, #tpu.memory_space<vmem>>, %arg3: memref<1x96xf32, #tpu.memory_space<vmem>>, %arg4: memref<32x32xbf16, #tpu.memory_space<vmem>>, %arg5: memref<3x32xf32, #tpu.memory_space<vmem>>, %arg6: memref<8x32xf32, #tpu.memory_space<vmem>>, %arg7: memref<8x32xbf16, #tpu.memory_space<vmem>>) attributes {dimension_semantics = [#tpu.dimension_semantics<parallel>], iteration_bounds = array<i64: 2>, scalar_prefetch = 0 : i64, scratch_operands = 1 : i64, tpu.core_type = #tpu.core_type<tc>, window_params = [{transform_indices = @transform_0, window_bounds = array<i64: 8, 32>}, {pipeline_mode = #tpu.pipeline_mode<synchronous>, transform_indices = @transform_1, window_bounds = array<i64: 32, 96>}, {pipeline_mode = #tpu.pipeline_mode<synchronous>, transform_indices = @transform_2, window_bounds = array<i64: 1, 96>}, {pipeline_mode = #tpu.pipeline_mode<synchronous>, transform_indices = @transform_3, window_bounds = array<i64: 32, 32>}, {pipeline_mode = #tpu.pipeline_mode<synchronous>, transform_indices = @transform_4, window_bounds = array<i64: 3, 32>}, {transform_indices = @transform_5, window_bounds = array<i64: 8, 32>}]} {
    %c0 = arith.constant 0 : index
    %c0_0 = arith.constant 0 : index
    %0 = vector.load %arg1[%c0, %c0_0] : memref<8x32xf32, #tpu.memory_space<vmem>>, vector<8x32xf32>
    %1 = arith.truncf %0 : vector<8x32xf32> to vector<8x32xbf16>
    %c0_1 = arith.constant 0 : index
    %c0_2 = arith.constant 0 : index
    %2 = vector.load %arg2[%c0_1, %c0_2] : memref<32x96xbf16, #tpu.memory_space<vmem>>, vector<32x96xbf16>
    %cst = arith.constant dense<0.000000e+00> : vector<8x96xf32>
    %3 = tpu.matmul %1, %2, %cst {dimension_numbers = #tpu.dot_dimension_numbers<[1], [0], [0], [1], [0, 0, 1, 1], [], []>} : vector<8x32xbf16>, vector<32x96xbf16>, vector<8x96xf32> -> vector<8x96xf32>
    %c0_3 = arith.constant 0 : index
    %c0_4 = arith.constant 0 : index
    %4 = vector.load %arg3[%c0_3, %c0_4] : memref<1x96xf32, #tpu.memory_space<vmem>>, vector<1x96xf32>
    %5 = vector.broadcast %4 : vector<1x96xf32> to vector<8x96xf32>
    %6 = arith.addf %3, %5 : vector<8x96xf32>
    %7 = vector.extract_strided_slice %6 {offsets = [0, 0], sizes = [8, 32], strides = [1, 1]} : vector<8x96xf32> to vector<8x32xf32>
    %8 = arith.truncf %7 : vector<8x32xf32> to vector<8x32xbf16>
    %9 = vector.extract_strided_slice %6 {offsets = [0, 32], sizes = [8, 32], strides = [1, 1]} : vector<8x96xf32> to vector<8x32xf32>
    %10 = arith.truncf %9 : vector<8x32xf32> to vector<8x32xbf16>
    %11 = vector.extract_strided_slice %6 {offsets = [0, 64], sizes = [8, 32], strides = [1, 1]} : vector<8x96xf32> to vector<8x32xf32>
    %12 = arith.truncf %11 : vector<8x32xf32> to vector<8x32xbf16>
    %13 = vector.extract_strided_slice %8 {offsets = [0, 0], sizes = [8, 8], strides = [1, 1]} : vector<8x32xbf16> to vector<8x8xbf16>
    %14 = vector.extract_strided_slice %10 {offsets = [0, 0], sizes = [8, 8], strides = [1, 1]} : vector<8x32xbf16> to vector<8x8xbf16>
    %15 = vector.extract_strided_slice %12 {offsets = [0, 0], sizes = [8, 8], strides = [1, 1]} : vector<8x32xbf16> to vector<8x8xbf16>
    %cst_5 = arith.constant dense<0.000000e+00> : vector<8x8xf32>
    %16 = tpu.matmul %13, %14, %cst_5 {dimension_numbers = #tpu.dot_dimension_numbers<[1], [1], [0], [0], [0, 0, 1, 0], [], []>} : vector<8x8xbf16>, vector<8x8xbf16>, vector<8x8xf32> -> vector<8x8xf32>
    %cst_6 = arith.constant dense<0xFF800000> : vector<8xf32>
    %17 = vector.multi_reduction <maximumf>, %16, %cst_6 [1] : vector<8x8xf32> to vector<8xf32>
    %18 = vector.shape_cast %17 : vector<8xf32> to vector<8x1xf32>
    %19 = vector.broadcast %18 : vector<8x1xf32> to vector<8x8xf32>
    %20 = arith.subf %16, %19 : vector<8x8xf32>
    %21 = math.exp %20 : vector<8x8xf32>
    %cst_7 = arith.constant dense<0.000000e+00> : vector<8xf32>
    %22 = vector.multi_reduction <add>, %21, %cst_7 [1] : vector<8x8xf32> to vector<8xf32>
    %23 = vector.shape_cast %22 : vector<8xf32> to vector<8x1xf32>
    %24 = tpu.reciprocal %23 {approx = true} : vector<8x1xf32> -> vector<8x1xf32>
    %25 = vector.broadcast %24 : vector<8x1xf32> to vector<8x8xf32>
    %26 = arith.mulf %21, %25 : vector<8x8xf32>
    %27 = arith.truncf %26 : vector<8x8xf32> to vector<8x8xbf16>
    %cst_8 = arith.constant dense<0.000000e+00> : vector<8x8xf32>
    %28 = tpu.matmul %27, %15, %cst_8 {dimension_numbers = #tpu.dot_dimension_numbers<[1], [0], [0], [1], [0, 0, 1, 1], [], []>} : vector<8x8xbf16>, vector<8x8xbf16>, vector<8x8xf32> -> vector<8x8xf32>
    %29 = arith.truncf %28 : vector<8x8xf32> to vector<8x8xbf16>
    %c0_9 = arith.constant 0 : index
    %c0_10 = arith.constant 0 : index
    %30 = vector.load %arg7[%c0_9, %c0_10] : memref<8x32xbf16, #tpu.memory_space<vmem>>, vector<8x8xbf16>
    tpu.vector_store %arg7[%c0_9, %c0_10], %29 {strides = array<i32>} : memref<8x32xbf16, #tpu.memory_space<vmem>>, vector<8x8xbf16>,
    %31 = vector.extract_strided_slice %8 {offsets = [0, 8], sizes = [8, 8], strides = [1, 1]} : vector<8x32xbf16> to vector<8x8xbf16>
    %32 = vector.extract_strided_slice %10 {offsets = [0, 8], sizes = [8, 8], strides = [1, 1]} : vector<8x32xbf16> to vector<8x8xbf16>
    %33 = vector.extract_strided_slice %12 {offsets = [0, 8], sizes = [8, 8], strides = [1, 1]} : vector<8x32xbf16> to vector<8x8xbf16>
    %cst_11 = arith.constant dense<0.000000e+00> : vector<8x8xf32>
    %34 = tpu.matmul %31, %32, %cst_11 {dimension_numbers = #tpu.dot_dimension_numbers<[1], [1], [0], [0], [0, 0, 1, 0], [], []>} : vector<8x8xbf16>, vector<8x8xbf16>, vector<8x8xf32> -> vector<8x8xf32>
    %cst_12 = arith.constant dense<0xFF800000> : vector<8xf32>
    %35 = vector.multi_reduction <maximumf>, %34, %cst_12 [1] : vector<8x8xf32> to vector<8xf32>
    %36 = vector.shape_cast %35 : vector<8xf32> to vector<8x1xf32>
    %37 = vector.broadcast %36 : vector<8x1xf32> to vector<8x8xf32>
    %38 = arith.subf %34, %37 : vector<8x8xf32>
    %39 = math.exp %38 : vector<8x8xf32>
    %cst_13 = arith.constant dense<0.000000e+00> : vector<8xf32>
    %40 = vector.multi_reduction <add>, %39, %cst_13 [1] : vector<8x8xf32> to vector<8xf32>
    %41 = vector.shape_cast %40 : vector<8xf32> to vector<8x1xf32>
    %42 = tpu.reciprocal %41 {approx = true} : vector<8x1xf32> -> vector<8x1xf32>
    %43 = vector.broadcast %42 : vector<8x1xf32> to vector<8x8xf32>
    %44 = arith.mulf %39, %43 : vector<8x8xf32>
    %45 = arith.truncf %44 : vector<8x8xf32> to vector<8x8xbf16>
    %cst_14 = arith.constant dense<0.000000e+00> : vector<8x8xf32>
    %46 = tpu.matmul %45, %33, %cst_14 {dimension_numbers = #tpu.dot_dimension_numbers<[1], [0], [0], [1], [0, 0, 1, 1], [], []>} : vector<8x8xbf16>, vector<8x8xbf16>, vector<8x8xf32> -> vector<8x8xf32>
    %47 = arith.truncf %46 : vector<8x8xf32> to vector<8x8xbf16>
    %c0_15 = arith.constant 0 : index
    %c8 = arith.constant 8 : index
    %48 = vector.load %arg7[%c0_15, %c8] : memref<8x32xbf16, #tpu.memory_space<vmem>>, vector<8x8xbf16>
    tpu.vector_store %arg7[%c0_15, %c8], %47 {strides = array<i32>} : memref<8x32xbf16, #tpu.memory_space<vmem>>, vector<8x8xbf16>,
    %49 = vector.extract_strided_slice %8 {offsets = [0, 16], sizes = [8, 8], strides = [1, 1]} : vector<8x32xbf16> to vector<8x8xbf16>
    %50 = vector.extract_strided_slice %10 {offsets = [0, 16], sizes = [8, 8], strides = [1, 1]} : vector<8x32xbf16> to vector<8x8xbf16>
    %51 = vector.extract_strided_slice %12 {offsets = [0, 16], sizes = [8, 8], strides = [1, 1]} : vector<8x32xbf16> to vector<8x8xbf16>
    %cst_16 = arith.constant dense<0.000000e+00> : vector<8x8xf32>
    %52 = tpu.matmul %49, %50, %cst_16 {dimension_numbers = #tpu.dot_dimension_numbers<[1], [1], [0], [0], [0, 0, 1, 0], [], []>} : vector<8x8xbf16>, vector<8x8xbf16>, vector<8x8xf32> -> vector<8x8xf32>
    %cst_17 = arith.constant dense<0xFF800000> : vector<8xf32>
    %53 = vector.multi_reduction <maximumf>, %52, %cst_17 [1] : vector<8x8xf32> to vector<8xf32>
    %54 = vector.shape_cast %53 : vector<8xf32> to vector<8x1xf32>
    %55 = vector.broadcast %54 : vector<8x1xf32> to vector<8x8xf32>
    %56 = arith.subf %52, %55 : vector<8x8xf32>
    %57 = math.exp %56 : vector<8x8xf32>
    %cst_18 = arith.constant dense<0.000000e+00> : vector<8xf32>
    %58 = vector.multi_reduction <add>, %57, %cst_18 [1] : vector<8x8xf32> to vector<8xf32>
    %59 = vector.shape_cast %58 : vector<8xf32> to vector<8x1xf32>
    %60 = tpu.reciprocal %59 {approx = true} : vector<8x1xf32> -> vector<8x1xf32>
    %61 = vector.broadcast %60 : vector<8x1xf32> to vector<8x8xf32>
    %62 = arith.mulf %57, %61 : vector<8x8xf32>
    %63 = arith.truncf %62 : vector<8x8xf32> to vector<8x8xbf16>
    %cst_19 = arith.constant dense<0.000000e+00> : vector<8x8xf32>
    %64 = tpu.matmul %63, %51, %cst_19 {dimension_numbers = #tpu.dot_dimension_numbers<[1], [0], [0], [1], [0, 0, 1, 1], [], []>} : vector<8x8xbf16>, vector<8x8xbf16>, vector<8x8xf32> -> vector<8x8xf32>
    %65 = arith.truncf %64 : vector<8x8xf32> to vector<8x8xbf16>
    %c0_20 = arith.constant 0 : index
    %c16 = arith.constant 16 : index
    %66 = vector.load %arg7[%c0_20, %c16] : memref<8x32xbf16, #tpu.memory_space<vmem>>, vector<8x8xbf16>
    tpu.vector_store %arg7[%c0_20, %c16], %65 {strides = array<i32>} : memref<8x32xbf16, #tpu.memory_space<vmem>>, vector<8x8xbf16>,
    %67 = vector.extract_strided_slice %8 {offsets = [0, 24], sizes = [8, 8], strides = [1, 1]} : vector<8x32xbf16> to vector<8x8xbf16>
    %68 = vector.extract_strided_slice %10 {offsets = [0, 24], sizes = [8, 8], strides = [1, 1]} : vector<8x32xbf16> to vector<8x8xbf16>
    %69 = vector.extract_strided_slice %12 {offsets = [0, 24], sizes = [8, 8], strides = [1, 1]} : vector<8x32xbf16> to vector<8x8xbf16>
    %cst_21 = arith.constant dense<0.000000e+00> : vector<8x8xf32>
    %70 = tpu.matmul %67, %68, %cst_21 {dimension_numbers = #tpu.dot_dimension_numbers<[1], [1], [0], [0], [0, 0, 1, 0], [], []>} : vector<8x8xbf16>, vector<8x8xbf16>, vector<8x8xf32> -> vector<8x8xf32>
    %cst_22 = arith.constant dense<0xFF800000> : vector<8xf32>
    %71 = vector.multi_reduction <maximumf>, %70, %cst_22 [1] : vector<8x8xf32> to vector<8xf32>
    %72 = vector.shape_cast %71 : vector<8xf32> to vector<8x1xf32>
    %73 = vector.broadcast %72 : vector<8x1xf32> to vector<8x8xf32>
    %74 = arith.subf %70, %73 : vector<8x8xf32>
    %75 = math.exp %74 : vector<8x8xf32>
    %cst_23 = arith.constant dense<0.000000e+00> : vector<8xf32>
    %76 = vector.multi_reduction <add>, %75, %cst_23 [1] : vector<8x8xf32> to vector<8xf32>
    %77 = vector.shape_cast %76 : vector<8xf32> to vector<8x1xf32>
    %78 = tpu.reciprocal %77 {approx = true} : vector<8x1xf32> -> vector<8x1xf32>
    %79 = vector.broadcast %78 : vector<8x1xf32> to vector<8x8xf32>
    %80 = arith.mulf %75, %79 : vector<8x8xf32>
    %81 = arith.truncf %80 : vector<8x8xf32> to vector<8x8xbf16>
    %cst_24 = arith.constant dense<0.000000e+00> : vector<8x8xf32>
    %82 = tpu.matmul %81, %69, %cst_24 {dimension_numbers = #tpu.dot_dimension_numbers<[1], [0], [0], [1], [0, 0, 1, 1], [], []>} : vector<8x8xbf16>, vector<8x8xbf16>, vector<8x8xf32> -> vector<8x8xf32>
    %83 = arith.truncf %82 : vector<8x8xf32> to vector<8x8xbf16>
    %c0_25 = arith.constant 0 : index
    %c24 = arith.constant 24 : index
    %84 = vector.load %arg7[%c0_25, %c24] : memref<8x32xbf16, #tpu.memory_space<vmem>>, vector<8x8xbf16>
    tpu.vector_store %arg7[%c0_25, %c24], %83 {strides = array<i32>} : memref<8x32xbf16, #tpu.memory_space<vmem>>, vector<8x8xbf16>,
    %c0_26 = arith.constant 0 : index
    %c0_27 = arith.constant 0 : index
    %85 = vector.load %arg7[%c0_26, %c0_27] : memref<8x32xbf16, #tpu.memory_space<vmem>>, vector<8x32xbf16>
    %c0_28 = arith.constant 0 : index
    %c0_29 = arith.constant 0 : index
    %86 = vector.load %arg4[%c0_28, %c0_29] : memref<32x32xbf16, #tpu.memory_space<vmem>>, vector<32x32xbf16>
    %cst_30 = arith.constant dense<0.000000e+00> : vector<8x32xf32>
    %87 = tpu.matmul %85, %86, %cst_30 {dimension_numbers = #tpu.dot_dimension_numbers<[1], [0], [0], [1], [0, 0, 1, 1], [], []>} : vector<8x32xbf16>, vector<32x32xbf16>, vector<8x32xf32> -> vector<8x32xf32>
    %c0_31 = arith.constant 0 : index
    %c0_32 = arith.constant 0 : index
    %88 = vector.load %arg5[%c0_31, %c0_32] : memref<3x32xf32, #tpu.memory_space<vmem>>, vector<1x32xf32>
    %89 = vector.broadcast %88 : vector<1x32xf32> to vector<8x32xf32>
    %90 = arith.addf %87, %89 : vector<8x32xf32>
    %91 = arith.addf %90, %0 : vector<8x32xf32>
    %cst_33 = arith.constant dense<0.000000e+00> : vector<8xf32>
    %92 = vector.multi_reduction <add>, %91, %cst_33 [1] : vector<8x32xf32> to vector<8xf32>
    %93 = vector.shape_cast %92 : vector<8xf32> to vector<8x1xf32>
    %cst_34 = arith.constant 3.200000e+01 : f32
    %94 = vector.broadcast %cst_34 : f32 to vector<8x1xf32>
    %95 = arith.divf %93, %94 : vector<8x1xf32>
    %96 = vector.broadcast %95 : vector<8x1xf32> to vector<8x32xf32>
    %97 = arith.subf %91, %96 : vector<8x32xf32>
    %98 = arith.mulf %97, %97 : vector<8x32xf32>
    %cst_35 = arith.constant dense<0.000000e+00> : vector<8xf32>
    %99 = vector.multi_reduction <add>, %98, %cst_35 [1] : vector<8x32xf32> to vector<8xf32>
    %100 = vector.shape_cast %99 : vector<8xf32> to vector<8x1xf32>
    %cst_36 = arith.constant 3.200000e+01 : f32
    %101 = vector.broadcast %cst_36 : f32 to vector<8x1xf32>
    %102 = arith.divf %100, %101 : vector<8x1xf32>
    %c1 = arith.constant 1 : index
    %c0_37 = arith.constant 0 : index
    %103 = vector.load %arg5[%c1, %c0_37] : memref<3x32xf32, #tpu.memory_space<vmem>>, vector<1x32xf32>
    %104 = vector.broadcast %95 : vector<8x1xf32> to vector<8x32xf32>
    %105 = arith.subf %91, %104 : vector<8x32xf32>
    %cst_38 = arith.constant 9.99999996E-13 : f32
    %106 = vector.broadcast %cst_38 : f32 to vector<8x1xf32>
    %107 = arith.addf %102, %106 : vector<8x1xf32>
    %108 = math.rsqrt %107 : vector<8x1xf32>
    %109 = vector.broadcast %108 : vector<8x1xf32> to vector<8x32xf32>
    %110 = arith.mulf %105, %109 : vector<8x32xf32>
    %111 = vector.broadcast %103 : vector<1x32xf32> to vector<8x32xf32>
    %112 = arith.mulf %111, %110 : vector<8x32xf32>
    %c2 = arith.constant 2 : index
    %c0_39 = arith.constant 0 : index
    %113 = vector.load %arg5[%c2, %c0_39] : memref<3x32xf32, #tpu.memory_space<vmem>>, vector<1x32xf32>
    %114 = vector.broadcast %113 : vector<1x32xf32> to vector<8x32xf32>
    %115 = arith.addf %112, %114 : vector<8x32xf32>
    %c0_40 = arith.constant 0 : index
    %c0_41 = arith.constant 0 : index
    %116 = vector.load %arg6[%c0_40, %c0_41] : memref<8x32xf32, #tpu.memory_space<vmem>>, vector<8x32xf32>
    tpu.vector_store %arg6[%c0_40, %c0_41], %115 {strides = array<i32>} : memref<8x32xf32, #tpu.memory_space<vmem>>, vector<8x32xf32>,
    return
  }
  func.func @transform_0(%arg0: i32) -> (i32, i32) {
    %c0_i32 = arith.constant 0 : i32
    %c0_i32_0 = arith.constant 0 : i32
    return %arg0, %c0_i32 : i32, i32
  }
  func.func @transform_1(%arg0: i32) -> (i32, i32) {
    %c0_i32 = arith.constant 0 : i32
    %c0_i32_0 = arith.constant 0 : i32
    %c0_i32_1 = arith.constant 0 : i32
    return %c0_i32, %c0_i32_0 : i32, i32
  }
  func.func @transform_2(%arg0: i32) -> (i32, i32) {
    %c0_i32 = arith.constant 0 : i32
    %c0_i32_0 = arith.constant 0 : i32
    %c0_i32_1 = arith.constant 0 : i32
    return %c0_i32, %c0_i32_0 : i32, i32
  }
  func.func @transform_3(%arg0: i32) -> (i32, i32) {
    %c0_i32 = arith.constant 0 : i32
    %c0_i32_0 = arith.constant 0 : i32
    %c0_i32_1 = arith.constant 0 : i32
    return %c0_i32, %c0_i32_0 : i32, i32
  }
  func.func @transform_4(%arg0: i32) -> (i32, i32) {
    %c0_i32 = arith.constant 0 : i32
    %c0_i32_0 = arith.constant 0 : i32
    %c0_i32_1 = arith.constant 0 : i32
    return %c0_i32, %c0_i32_0 : i32, i32
  }
  func.func @transform_5(%arg0: i32) -> (i32, i32) {
    %c0_i32 = arith.constant 0 : i32
    %c0_i32_0 = arith.constant 0 : i32
    return %arg0, %c0_i32 : i32, i32
  }
}

</mosaic_0001>

<bundles_post_ra>
// kernel: tpu_custom_call.1
= control target key start
LH: loop header
LB: loop body
LE: loop exit
PB: predicated region body
PF: predicated region fallthrough
CT: control target
= control target key end

     0   :  { %10 = vsyncpa [#allocation4], 0  ;;  %s1775_s0 = inlined_call_operand.hbm [shape: f32[16,32], index: 0, kind: input, shape index: {}]   ;;  %s1776_s1 = inlined_call_operand.hbm [shape: bf16[32,96], index: 1, kind: input, shape index: {}]   ;;  %s1777_s2 = inlined_call_operand.vmem [shape: f32[1,96], index: 2, kind: input, shape index: {}]   ;;  %s1778_s3 = inlined_call_operand.hbm [shape: bf16[32,32], index: 3, kind: input, shape index: {}]   ;;  %s1779_s4 = inlined_call_operand.vmem [shape: f32[3,32], index: 4, kind: input, shape index: {}]   ;;  %s1780_s5 = inlined_call_operand.hbm [shape: f32[16,32], index: 5, kind: output, shape index: {}]  }
   0x1   :  { %12 = vsyncpa [#allocation4 + $0x1], 0 }
   0x2   :  { %13 = vsyncpa [#allocation7], 0 }
   0x3   :  { %14 = vsyncpa [#allocation5], 0 }
   0x4   :  { %16 = vsyncpa [#allocation5 + $0x1], 0  ;;  %s1450_s18 = smov 0   ;;  %s1452_s19 = smov 0  }
   0x5   :  { %s1454_s20 = smov 0   ;;  %s1456_s21 = smov 0  }
   0x6 LB: > { %s1471_s22 = sadd.s32 4294967295, %s1396_s21   ;;  %s1007_s23 = sadd.s32 4294967294, %s1396_s21   ;;  %s1396_s21 = sphi %s1456_s21, %s1800_s21   ;;  %s1392_s20 = sphi %s1454_s20, %s1799_s20   ;;  %s1388_s19 = sphi %s1452_s19, %s1798_s19   ;;  %s1384_s18 = sphi %s1450_s18, %s1797_s18  }
   0x7   : > { %p42_p0 = scmp.ne.s32.totalorder %s1388_s19, %s1384_s18  ;;  %p1781_p1 = scmp.eq.s32.totalorder %s1471_s22, 0 }
   0x8   : > { %p156_p3 = scmp.eq.s32.totalorder %s1007_s23, 1  ;;  %p1008_p5 = scmp.ge.s32.totalorder %s1396_s21, 1 }
   0x9   : > { %p1480_p4 = por %p1781_p1, %p42_p0  ;;  %p163_p7 = scmp.lt.s32.totalorder %s1396_s21, 3 }
   0xa   : > { %p1485_p6 = por %p156_p3, %p42_p0  ;;  %s1398_s27 = smov [#allocation6]  }
   0xb   : > { %s1784_s24 = scalar_select %p1480_p4, 1, 0 }
   0xc   : > { %s1785_s25 = scalar_select %p1485_p6, 1, 0 }
   0xd   : > { %p1490_p8 = pnand %p1008_p5, %p163_p7  ;;  %s175_s28 = sshll.u32 %s1398_s27, 4  ;;  %s1494_s28 = int_to_ptr.vmem [resolvable:$true] %s175_s28 }
   0xe   : > { %s1399_s30 = smov [#allocation8]   ;;  %s1240_s9 = scalar_lea.hbm %s1776_s1, 256 }
   0xf   : > { %p1145_p9 = pneg %p1490_p8  ;;  %s191_s6 = sshll.u32 %s1399_s30, 4  ;;  %s1505_s6 = int_to_ptr.vmem [resolvable:$true] %s191_s6 }
  0x10   : > { %p1241_p12 = scmp.ne.s32.totalorder %s1776_s1, %s1240_s9  ;;  %p1247_p5 = scmp.lt.u32.totalorder %s1240_s9, %s1776_s1 }
  0x11   : > { %p1501_p11 = pnand %p1145_p9, %p1781_p1 }
  0x13   : > { %p1242_p13 = pneg %p1501_p11 }
  0x15   : > { %p1243_p0 = pnand %p1242_p13, %p1241_p12 }
  0x17   : > { %p1244_p3 = pneg %p1243_p0 }
  0x19   : > { %p1249_p7 = pnand %p1247_p5, %p1244_p3 }
  0x1b   : > { %1252 = shalt.err (!%p1249_p7)
}
  0x1c   : > { %s1253_s14 = scalar_lea.vmem %s1494_s28, 256  ;;  %p1261_p2 = scmp.lt.s32.totalorder %s1494_s28, %s1494_s28 }
  0x1d   : > { %p1254_p9 = scmp.ne.s32.totalorder %s1494_s28, %s1253_s14  ;;  %p1262_p12 = scmp.lt.s32.totalorder %s1253_s14, %s1253_s14 }
  0x1f   : > { %p1256_p10 = pnand %p1254_p9, %p1242_p13  ;;  %p1263_p0 = por %p1262_p12, %p1261_p2 }
  0x21   : > { %p1257_p1 = pneg %p1256_p10 }
  0x23   : > { %p1264_p6 = pnand %p1263_p0, %p1257_p1 }
  0x25   : > { %1267 = shalt.err (!%p1264_p6)
}
  0x26   : > { %s1400_s15 = smov 64   ;;  %s1401_s16 = smov 4  }
  0x27   : > { %1148 = dma.hbm_to_vmem [thread:$0]  (!%p1501_p11), %s1776_s1, 256, %s1494_s28, [#allocation7], %s1400_s15, %s1400_s15, %s1401_s16  }
  0x28   : > { %s1268_s7 = scalar_lea.hbm %s1778_s3, 256 }
  0x29   : > { %p1269_p2 = scmp.ne.s32.totalorder %s1778_s3, %s1268_s7  ;;  %p1275_p10 = scmp.lt.u32.totalorder %s1268_s7, %s1778_s3 }
  0x2b   : > { %p1271_p1 = pnand %p1269_p2, %p1242_p13 }
  0x2d   : > { %p1272_p6 = pneg %p1271_p1 }
  0x2f   : > { %p1277_p3 = pnand %p1275_p10, %p1272_p6 }
  0x31   : > { %1280 = shalt.err (!%p1277_p3)
}
  0x32   : > { %s1281_s28 = scalar_lea.vmem %s1505_s6, 256  ;;  %p1289_p12 = scmp.lt.s32.totalorder %s1505_s6, %s1505_s6 }
  0x33   : > { %p1282_p5 = scmp.ne.s32.totalorder %s1505_s6, %s1281_s28  ;;  %p1290_p0 = scmp.lt.s32.totalorder %s1281_s28, %s1281_s28 }
  0x35   : > { %p1284_p7 = pnand %p1282_p5, %p1242_p13  ;;  %p1291_p2 = por %p1290_p0, %p1289_p12 }
  0x37   : > { %p1285_p9 = pneg %p1284_p7 }
  0x39   : > { %p1292_p1 = pnand %p1291_p2, %p1285_p9 }
  0x3b   : > { %1295 = shalt.err (!%p1292_p1)
}
  0x3c   : > { %1151 = dma.hbm_to_vmem [thread:$0]  (!%p1501_p11), %s1778_s3, 256, %s1505_s6, [#allocation7], %s1400_s15, %s1400_s15, %s1401_s16  }
  0x3d   : > { %s1560_s14 = sadd.s32 1, %s1396_s21   ;;  %s29_s29 = sadd.s32 1, %s1392_s20 }
  0x3e   : > { %s26_s17 = ssub.s32 %s1396_s21, %s1560_s14  ;;  %p36_p13 = scmp.ne.s32.totalorder %s1392_s20, %s1388_s19 }
  0x3f   : > { %p27_p6 = scmp.eq.s32.totalorder %s26_s17, 0  ;;  %p37_p10 = scmp.eq.s32.totalorder %s1396_s21, 0 }
  0x40   : > { %p1788_p3 = scmp.eq.s32.totalorder %s1471_s22, 1  ;;  %p1162_p7 = scmp.lt.s32.totalorder %s1396_s21, 2 }
  0x41   : > { %s1576_s27 = scalar_select %p27_p6, %s1392_s20, %s29_s29  }
  0x42   : > { %p1570_p5 = por %p1788_p3, %p36_p13  ;;  %p38_p9 = por %p37_p10, %p36_p13 }
  0x43   : > { %s208_s30 = sand.u32 1, %s1392_s20   ;;  %s1013_s6 = sshll.u32 %s1396_s21, 7 }
  0x44   : > { %s1789_s23 = scalar_select %p1570_p5, 1, 0 }
  0x45   : > { %s1012_s7 = sshll.u32 %s208_s30, 3  ;;  %s1583_s8 = scalar_lea.hbm %s1775_s0, %s1013_s6 }
  0x46   : > { %s212_s9 = scalar_lea.vmem [#allocation3], %s1012_s7  ;;  %p1587_p11 = pnand %p1162_p7, %p38_p9 }
  0x47   : > { %s219_s10 = sshll.u32 %s212_s9, 4  ;;  %s209_s28 = scalar_lea.sflag [#allocation4], %s208_s30  ;;  %s1585_s10 = int_to_ptr.vmem [resolvable:$true] %s219_s10 }
  0x48   : > { %s1296_s12 = scalar_lea.hbm %s1583_s8, 128  ;;  %p1298_p0 = pneg %p1587_p11 }
  0x49   : > { %p1297_p12 = scmp.ne.s32.totalorder %s1583_s8, %s1296_s12  ;;  %s1301_s17 = scalar_lea.hbm %s1775_s0, 256 }
  0x4a   : > { %p1302_p13 = scmp.lt.u32.totalorder %s1583_s8, %s1775_s0  ;;  %p1303_p6 = scmp.lt.u32.totalorder %s1301_s17, %s1296_s12 }
  0x4b   : > { %p1299_p2 = pnand %p1298_p0, %p1297_p12  ;;  %p1305_p3 = scmp.lt.u32.totalorder %s1296_s12, %s1583_s8 }
  0x4c   : > { %p1304_p10 = por %p1303_p6, %p1302_p13 }
  0x4d   : > { %p1300_p1 = pneg %p1299_p2 }
  0x4e   : > { %p1306_p7 = por %p1305_p3, %p1304_p10 }
  0x50   : > { %p1307_p9 = pnand %p1306_p7, %p1300_p1 }
  0x52   : > { %1310 = shalt.err (!%p1307_p9)
}
  0x53   : > { %s1311_s30 = scalar_lea.vmem %s1585_s10, 128  ;;  %s1402_s15 = smov [#allocation3]  }
  0x54   : > { %p1312_p12 = scmp.ne.s32.totalorder %s1585_s10, %s1311_s30  ;;  %s1316_s16 = sshll.u32 %s1402_s15, 4  ;;  %s1317_s16 = int_to_ptr.vmem [resolvable:$false] %s1316_s16 }
  0x55   : > { %s1318_s9 = scalar_lea.vmem %s1317_s16, 256  ;;  %p1319_p4 = scmp.lt.s32.totalorder %s1585_s10, %s1317_s16 }
  0x56   : > { %p1314_p2 = pnand %p1312_p12, %p1298_p0  ;;  %p1320_p13 = scmp.lt.s32.totalorder %s1318_s9, %s1311_s30 }
  0x58   : > { %p1315_p5 = pneg %p1314_p2  ;;  %p1321_p6 = por %p1320_p13, %p1319_p4 }
  0x5a   : > { %p1322_p10 = pnand %p1321_p6, %p1315_p5 }
  0x5c   : > { %1325 = shalt.err (!%p1322_p10)
}
  0x5d   : > { %1155 = dma.hbm_to_vmem [thread:$0]  (!%p1587_p11), %s1583_s8, 128, %s1585_s10, %s209_s28  }
  0x5e   : > { %228 = sbr.rel (%p1490_p8) target bundleno = 1924 (0x784), region = 40  ;;  %s1619_s12 = sand.u32 (!%p1490_p8), 1, %s1388_s19  }
  0x5f   : > { %s1015_s13 = sshll.u32 (!%p1490_p8), %s1619_s12, 3  ;;  %s231_s29 = scalar_lea.sflag (!%p1490_p8), [#allocation4], %s1619_s12 }
  0x60   : > { %s234_s17 = scalar_lea.vmem (!%p1490_p8), [#allocation3], %s1015_s13  ;;  %p1791_p4 = scmp.ne.s32.totalorder (!%p1490_p8), %s1784_s24, 0 }
  0x65   : > { %1371 = dma.done.wait (%p1791_p4), %s231_s29, 128  }
  0x66   : > { %1373 = vsyncadd (%p1791_p4), %s231_s29, 4294967168  ;;  %p1792_p5 = scmp.eq.s32.totalorder %s1471_s22, 0 }
  0x68   : > { %1375 = dma.done.wait (%p1792_p5), [#allocation7], 512   ;;  %p1793_p8 = pmov %p1792_p5 }
  0x69   : > { %v1403_v0 = vmov 0.0   ;;  %vm1404_vm0 = vmmov 0   ;;  %v1218_v1 = vld [vmem:[#allocation6] sm:$0xff]   ;;  %v1219_v2 = vld [vmem:[#allocation6 + $0x8] sm:$0xff]   ;;  %v1639_v3 = vld [vmem:[%s234_s17] sm:$0xff]  ;;  %vm295_vm1 = vcmask 261120  }
  0x6a   : > { %1377 = vsyncadd (%p1793_p8), [#allocation7], 4294966784  ;;  %1069 = vmatprep.subr.bf16.mxu0 %v1403_v0  ;;  %1073 = vmatprep.mubr.msk.bf16.mxu0 %vm1404_vm0, %v1403_v0  ;;  %v271_v4 = vpack.c.bf16 %v1639_v3, %v1639_v3  ;;  %v1019_v5 = vld [vmem:[%s1777_s2] ss:$0 sm:$0xff]  ;;  %s1405_s8 = smov 120   ;;  %s1406_s10 = smov 96  }
  0x6b   : > { %1077 = vmatprep.subr.bf16.mxu1 %v1403_v0  ;;  %1079 = vmatprep.mubr.msk.bf16.mxu1 %vm1404_vm0, %v1403_v0  ;;  %s1407_s11 = smov 80   ;;  %s1408_s28 = smov 88   ;;  %vm343_vm2 = vcmask 64512   ;;  %vm407_vm3 = vcmask 1043456   ;;  %vm452_vm4 = vcmask 60416   ;;  %vm571_vm5 = vcmask 126016  }
  0x6c   : > { %1070 = vmatpush3.bf16.msra.mxu0 %v1218_v1  ;;  %s1409_s7 = smov 72   ;;  %s1410_s6 = smov 112   ;;  %vm690_vm6 = vcmask 191616   ;;  %vm809_vm7 = vcmask 257216  }
  0x6d   : > { %1071 = vmatprep.subr.bf16.mxu0 %v1403_v0  ;;  %s1411_s30 = smov 104   ;;  %s1412_s15 = smov 56  }
  0x6e   : > { %s1413_s16 = smov 64   ;;  %s1414_s9 = smov 40  }
  0x6f   : > { %s1415_s29 = smov 48   ;;  %s1416_s17 = smov 8  }
  0x70   : > { %1072 = vmatpush3.bf16.msra.mxu0 %v1219_v2  ;;  %s1417_s24 = smov 16   ;;  %s1418_s26 = smov 24  }
  0x71   : > { %1083 = vmatprep.subr.bf16.mxu0 %v1403_v0  ;;  %p1794_p0 = scmp.ne.s32.totalorder %s1789_s23, 0 }
  0x73   : > { %1074 = vmatmul.mubr.msk.bf16.vlgmr.msra.gmra.mrb[0].mxu0 %vm295_vm1, %v271_v4 }
  0x74   : > { %1085 = vmatprep.mubr.msk.bf16.mxu0 %vm1404_vm0, %v1403_v0 }
 0x146   : > { %v333_v6 = vpop.f32.mrb[0].mxu0 }
 0x147   : > { %v334_v7 = vadd.f32 %v1019_v5, %v333_v6  ;;  %v1075_v8 = vpop.f32.mrb[1].mxu0 }
 0x148   : > { %v336_v9 = vpop.f32.mrb[2].mxu0 }
 0x149   : > { %v1651_v10 = vpack.c.bf16 %v334_v7, %v334_v7  ;;  %v1076_v11 = vpop.f32.mrb[3].mxu0 }
 0x14b   : > { %454 = vrot.lane.b32.xlu1 %v1651_v10, %s1405_s8  ;;  %341 = vrot.lane.b32.xlu0 %v1651_v10, %s1406_s10 }
 0x14f   : > { %575 = vrot.lane.b32.xlu1 %v1651_v10, %s1407_s11  ;;  %456 = vrot.lane.b32.xlu0 %v1651_v10, %s1408_s28 }
 0x153   : > { %694 = vrot.lane.b32.xlu1 %v1651_v10, %s1409_s7  ;;  %573 = vrot.lane.b32.xlu0 %v1651_v10, %s1410_s6 }
 0x157   : > { %692 = vrot.lane.b32.xlu0 %v1651_v10, %s1411_s30  ;;  %s1041_s30 = sshll.u32 %s1471_s22, 7  ;;  %s1419_s22 = smov [#allocation9]  }
 0x1bd   : > { %v342_v12 = vpop.permute.xlu0 %341  ;;  %v455_v15 = vpop.permute.xlu1 %454 }
 0x1be   : > { %v348_v13 = vsel %vm343_vm2, %v342_v12, 0 }
 0x1bf   : > { %1078 = vmatpush3.bf16.xpose.msra.mxu1 %v348_v13 }
 0x1c0   : > { %1089 = vmatprep.subr.bf16.mxu1 %v1403_v0 }
 0x1c1   : > { %v457_v14 = vpop.permute.xlu0 %456  ;;  %v576_v17 = vpop.permute.xlu1 %575 }
 0x1c2   : > { %v462_v16 = vsel %vm343_vm2, %v457_v14, 0  ;;  %v581_v18 = vsel %vm343_vm2, %v576_v17, 0 }
 0x1c5   : > { %v695_v19 = vpop.permute.xlu1 %694  ;;  %v574_v20 = vpop.permute.xlu0 %573 }
 0x1c6   : > { %1080 = vmatmul.mubr.msk.bf16.vlgmr.msra.gmra.mrb[0].mxu1 %vm343_vm2, %v1651_v10  ;;  %v700_v21 = vsel %vm343_vm2, %v695_v19, 0 }
 0x1c7   : > { %1090 = vmatpush3.bf16.xpose.msra.mxu1 %v462_v16  ;;  %1091 = vmatprep.mubr.msk.bf16.mxu1 %vm1404_vm0, %v1403_v0 }
 0x1c8   : > { %1101 = vmatprep.subr.bf16.mxu1 %v1403_v0 }
 0x1c9   : > { %v693_v22 = vpop.permute.xlu0 %692 }
 0x1ce   : > { %1092 = vmatmul.mubr.msk.bf16.vlgmr.msra.gmra.mrb[4].mxu1 %vm343_vm2, %v455_v15 }
 0x1cf   : > { %1102 = vmatpush3.bf16.xpose.msra.mxu1 %v581_v18  ;;  %1103 = vmatprep.mubr.msk.bf16.mxu1 %vm1404_vm0, %v1403_v0 }
 0x1d0   : > { %1113 = vmatprep.subr.bf16.mxu1 %v1403_v0 }
 0x1d6   : > { %1104 = vmatmul.mubr.msk.bf16.vlgmr.msra.gmra.mrb[8].mxu1 %vm343_vm2, %v574_v20 }
 0x1d7   : > { %1114 = vmatpush3.bf16.xpose.msra.mxu1 %v700_v21  ;;  %1115 = vmatprep.mubr.msk.bf16.mxu1 %vm1404_vm0, %v1403_v0 }
 0x1d8   : > { %1125 = vmatprep.subr.bf16.mxu1 %v1403_v0 }
 0x1de   : > { %1116 = vmatmul.mubr.msk.bf16.vlgmr.msra.gmra.mrb[12].mxu1 %vm343_vm2, %v693_v22 }
 0x1df   : > { %1129 = vmatprep.mubr.msk.bf16.mxu1 %vm1404_vm0, %v1403_v0 }
 0x299   : > { %v384_v23 = vpop.f32.mrb[0].mxu1 }
 0x29a   : > { %v1081_v24 = vpop.f32.mrb[1].mxu1  ;;  %v390_v25 = vsel %vm343_vm2, %v384_v23, -inf }
 0x29b   : > { %391 = vmax.xlane.f32.xlu1 %v390_v25  ;;  %v387_v26 = vpop.f32.mrb[2].mxu1 }
 0x29c   : > { %v1082_v27 = vpop.f32.mrb[3].mxu1 }
 0x2a1   : > { %v498_v28 = vpop.f32.mrb[4].mxu1 }
 0x2a2   : > { %v1093_v29 = vpop.f32.mrb[5].mxu1  ;;  %v504_v30 = vsel %vm343_vm2, %v498_v28, -inf }
 0x2a3   : > { %505 = vmax.xlane.f32.xlu0 %v504_v30  ;;  %v501_v31 = vpop.f32.mrb[6].mxu1 }
 0x2a4   : > { %v1094_v32 = vpop.f32.mrb[7].mxu1 }
 0x2a9   : > { %v617_v33 = vpop.f32.mrb[8].mxu1 }
 0x2aa   : > { %v1105_v34 = vpop.f32.mrb[9].mxu1  ;;  %v623_v35 = vsel %vm343_vm2, %v617_v33, -inf }
 0x2ab   : > { %624 = vmax.xlane.f32.xlu0 %v623_v35  ;;  %v620_v36 = vpop.f32.mrb[10].mxu1  ;;  %v1220_v35 = vld [vmem:[#allocation8] sm:$0xff]  }
 0x2ac   : > { %v1106_v37 = vpop.f32.mrb[11].mxu1  ;;  %1126 = vmatpush3.bf16.msra.mxu1 %v1220_v35  ;;  %v1221_v36 = vld [vmem:[#allocation8 + $0x8] sm:$0xff]  }
 0x2ad   : > { %1127 = vmatprep.subr.bf16.mxu1 %v1403_v0 }
 0x2b0   : > { %1128 = vmatpush3.bf16.msra.mxu1 %v1221_v36 }
 0x2b1   : > { %v736_v38 = vpop.f32.mrb[12].mxu1 }
 0x2b2   : > { %v1117_v39 = vpop.f32.mrb[13].mxu1  ;;  %v742_v40 = vsel %vm343_vm2, %v736_v38, -inf }
 0x2b3   : > { %743 = vmax.xlane.f32.xlu1 %v742_v40  ;;  %v739_v41 = vpop.f32.mrb[14].mxu1 }
 0x2b4   : > { %v1118_v42 = vpop.f32.mrb[15].mxu1 }
 0x328   : > { %v392_v43 = vpop.xlane.xlu1 %391 }
 0x329   : > { %v393_v44 = vsub.f32 %v384_v23, %v392_v43 }
 0x32b   : > { %v394_v45 = vmul.f32 1.442695, %v393_v44 }
 0x32d   : > { %1222 = vpow2.f32 %v394_v45 }
 0x330   : > { %v506_v46 = vpop.xlane.xlu0 %505 }
 0x331   : > { %v507_v47 = vsub.f32 %v498_v28, %v506_v46 }
 0x333   : > { %v508_v48 = vmul.f32 1.442695, %v507_v47 }
 0x335   : > { %1224 = vpow2.f32 %v508_v48 }
 0x337   : > { %v1223_v49 = vpop.eup %1222 }
 0x338   : > { %v625_v50 = vpop.xlane.xlu0 %624  ;;  %v396_v51 = vsel %vm343_vm2, %v1223_v49, 0.0 }
 0x339   : > { %v626_v52 = vsub.f32 %v617_v33, %v625_v50  ;;  %397 = vadd.xlane.f32.xlu0 %v396_v51  ;;  %v1034_v50 = vld [vmem:[%s1779_s4] ss:$0 sm:$0xff] }
 0x33b   : > { %v627_v53 = vmul.f32 1.442695, %v626_v52 }
 0x33d   : > { %1226 = vpow2.f32 %v627_v53 }
 0x33f   : > { %v1225_v54 = vpop.eup %1224 }
 0x340   : > { %v510_v55 = vsel %vm343_vm2, %v1225_v54, 0.0  ;;  %v744_v58 = vpop.xlane.xlu1 %743 }
 0x341   : > { %511 = vadd.xlane.f32.xlu1 %v510_v55  ;;  %v745_v59 = vsub.f32 %v736_v38, %v744_v58 }
 0x343   : > { %v746_v60 = vmul.f32 1.442695, %v745_v59 }
 0x345   : > { %1228 = vpow2.f32 %v746_v60 }
 0x347   : > { %v1227_v56 = vpop.eup %1226 }
 0x348   : > { %v629_v57 = vsel %vm343_vm2, %v1227_v56, 0.0 }
 0x349   : > { %630 = vadd.xlane.f32.xlu0 %v629_v57 }
 0x34f   : > { %v1229_v61 = vpop.eup %1228 }
 0x350   : > { %v748_v62 = vsel %vm343_vm2, %v1229_v61, 0.0 }
 0x352   : > { %516 = vrot.lane.b32.xlu1 %v1651_v10, %s1412_s15  ;;  %s268_s15 = scalar_lea.vmem [#allocation9], %s1015_s13  ;;  %s1330_s13 = sshll.u32 %s1419_s22, 4  ;;  %s1331_s13 = int_to_ptr.vmem [resolvable:$false] %s1330_s13 }
 0x353   : > { %s1332_s8 = scalar_lea.vmem %s1331_s13, 256 }
 0x35f   : > { %402 = vrot.lane.b32.xlu0 %v1651_v10, %s1413_s16  ;;  %s918_s16 = sshll.u32 %s268_s15, 4  ;;  %s1732_s16 = int_to_ptr.vmem [resolvable:$true] %s918_s16 }
 0x360   : > { %p1333_p7 = scmp.lt.s32.totalorder %s1732_s16, %s1331_s13 }
 0x363   : > { %754 = vrot.lane.b32.xlu0 %v1651_v10, %s1414_s9 }
 0x376   : > { %749 = vadd.xlane.f32.xlu1 %v748_v62 }
 0x387   : > { %635 = vrot.lane.b32.xlu1 %v1651_v10, %s1415_s29 }
 0x3c6   : > { %v398_v63 = vpop.xlane.xlu0 %397 }
 0x3c7   : > { %1230 = vrcp.f32 %v398_v63 }
 0x3ce   : > { %v512_v1 = vpop.xlane.xlu1 %511 }
 0x3cf   : > { %1232 = vrcp.f32 %v512_v1 }
 0x3d1   : > { %v1231_v2 = vpop.eup %1230 }
 0x3d2   : > { %v400_v5 = vmul.f32 %v1231_v2, %v1223_v49  ;;  %v517_v8 = vpop.permute.xlu1 %516 }
 0x3d3   : > { %v522_v12 = vsel %vm407_vm3, %v517_v8, 0 }
 0x3d4   : > { %v401_v9 = vpack.c.bf16 %v400_v5, %v400_v5 }
 0x3d6   : > { %v631_v4 = vpop.xlane.xlu0 %630 }
 0x3d7   : > { %1234 = vrcp.f32 %v631_v4 }
 0x3d9   : > { %v1233_v11 = vpop.eup %1232 }
 0x3da   : > { %v403_v6 = vpop.permute.xlu0 %402  ;;  %v514_v10 = vmul.f32 %v1233_v11, %v1225_v54 }
 0x3db   : > { %v409_v7 = vsel %vm407_vm3, %v403_v6, 0  ;;  %v1039_v6 = vld [vmem:[%s1779_s4 + $0x2] ss:$0 sm:$0xff] }
 0x3dc   : > { %1084 = vmatpush3.bf16.msra.mxu0 %v409_v7  ;;  %v515_v13 = vpack.c.bf16 %v514_v10, %v514_v10 }
 0x3dd   : > { %1095 = vmatprep.subr.bf16.mxu0 %v1403_v0 }
 0x3de   : > { %v755_v19 = vpop.permute.xlu0 %754 }
 0x3df   : > { %1086 = vmatmul.mubr.msk.bf16.vlgmr.msra.gmra.mrb[4].mxu0 %vm343_vm2, %v401_v9  ;;  %v760_v21 = vsel %vm407_vm3, %v755_v19, 0 }
 0x3e0   : > { %1096 = vmatpush3.bf16.msra.mxu0 %v522_v12  ;;  %1097 = vmatprep.mubr.msk.bf16.mxu0 %vm1404_vm0, %v1403_v0 }
 0x3e1   : > { %1107 = vmatprep.subr.bf16.mxu0 %v1403_v0  ;;  %v1235_v14 = vpop.eup %1234 }
 0x3e2   : > { %v633_v16 = vmul.f32 %v1235_v14, %v1227_v56 }
 0x3e4   : > { %v634_v20 = vpack.c.bf16 %v633_v16, %v633_v16 }
 0x3e7   : > { %1098 = vmatmul.mubr.msk.bf16.vlgmr.msra.gmra.mrb[8].mxu0 %vm343_vm2, %v515_v13 }
 0x3e8   : > { %1109 = vmatprep.mubr.msk.bf16.mxu0 %vm1404_vm0, %v1403_v0 }
 0x403   : > { %v750_v15 = vpop.xlane.xlu1 %749 }
 0x404   : > { %1236 = vrcp.f32 %v750_v15 }
 0x407   : > { %v636_v17 = vpop.permute.xlu1 %635 }
 0x408   : > { %v641_v18 = vsel %vm407_vm3, %v636_v17, 0 }
 0x409   : > { %1108 = vmatpush3.bf16.msra.mxu0 %v641_v18 }
 0x40a   : > { %1119 = vmatprep.subr.bf16.mxu0 %v1403_v0 }
 0x40c   : > { %1110 = vmatmul.mubr.msk.bf16.vlgmr.msra.gmra.mrb[12].mxu0 %vm343_vm2, %v634_v20 }
 0x40d   : > { %1120 = vmatpush3.bf16.msra.mxu0 %v760_v21  ;;  %1121 = vmatprep.mubr.msk.bf16.mxu0 %vm1404_vm0, %v1403_v0 }
 0x40e   : > { %v1237_v22 = vpop.eup %1236 }
 0x40f   : > { %v752_v23 = vmul.f32 %v1237_v22, %v1229_v61 }
 0x411   : > { %v753_v24 = vpack.c.bf16 %v752_v23, %v752_v23 }
 0x414   : > { %1122 = vmatmul.mubr.msk.bf16.vlgmr.msra.gmra.mrb[16].mxu0 %vm343_vm2, %v753_v24 }
 0x4b2   : > { %v445_v25 = vpop.f32.mrb[4].mxu0 }
 0x4b3   : > { %v451_v26 = vpack.c.bf16 %v445_v25, %v445_v25  ;;  %v1087_v27 = vpop.f32.mrb[5].mxu0 }
 0x4b4   : > { %v448_v28 = vpop.f32.mrb[6].mxu0 }
 0x4b5   : > { %453 = vst.msk [vmem:[#allocation2] sm:$0xf] %vm452_vm4, %v451_v26  ;;  %v1088_v29 = vpop.f32.mrb[7].mxu0 }
 0x4ba   : > { %v558_v30 = vpop.f32.mrb[8].mxu0 }
 0x4bb   : > { %v1044_v31 = vpack.c.bf16 %v558_v30, %v558_v30  ;;  %v1099_v32 = vpop.f32.mrb[9].mxu0 }
 0x4bc   : > { %v561_v33 = vpop.f32.mrb[10].mxu0 }
 0x4bd   : > { %568 = vrot.lane.b32.xlu1 %v1044_v31, %s1416_s17  ;;  %v1100_v34 = vpop.f32.mrb[11].mxu0  ;;  %s1730_s17 = scalar_lea.hbm %s1780_s5, %s1041_s30 }
 0x4df   : > { %v677_v37 = vpop.f32.mrb[12].mxu0 }
 0x4e0   : > { %v1045_v38 = vpack.c.bf16 %v677_v37, %v677_v37  ;;  %v1111_v39 = vpop.f32.mrb[13].mxu0 }
 0x4e1   : > { %v680_v40 = vpop.f32.mrb[14].mxu0 }
 0x4e2   : > { %687 = vrot.lane.b32.xlu0 %v1045_v38, %s1417_s24  ;;  %v1112_v41 = vpop.f32.mrb[15].mxu0  ;;  %s905_s24 = scalar_lea.sflag [#allocation5], %s1619_s12 }
 0x4e7   : > { %v796_v42 = vpop.f32.mrb[16].mxu0 }
 0x4e8   : > { %v1046_v43 = vpack.c.bf16 %v796_v42, %v796_v42  ;;  %v1123_v44 = vpop.f32.mrb[17].mxu0 }
 0x4e9   : > { %v799_v45 = vpop.f32.mrb[18].mxu0 }
 0x4ea   : > { %806 = vrot.lane.b32.xlu1 %v1046_v43, %s1418_s26  ;;  %v1124_v46 = vpop.f32.mrb[19].mxu0  ;;  %s1326_s26 = scalar_lea.vmem %s1732_s16, 128 }
 0x4eb   : > { %p1327_p11 = scmp.ne.s32.totalorder %s1732_s16, %s1326_s26  ;;  %p1334_p9 = scmp.lt.s32.totalorder %s1332_s8, %s1326_s26 }
 0x4ed   : > { %p1328_p1 = pnand %p1327_p11, %p1794_p0  ;;  %p1335_p12 = por %p1334_p9, %p1333_p7 }
 0x4ef   : > { %p1329_p3 = pneg %p1328_p1 }
 0x4f1   : > { %p1336_p2 = pnand %p1335_p12, %p1329_p3 }
 0x52f   : > { %v569_v47 = vpop.permute.xlu1 %568 }
 0x530   : > { %572 = vst.msk [vmem:[#allocation2] sm:$0xf] %vm571_vm5, %v569_v47 }
 0x554   : > { %v688_v48 = vpop.permute.xlu0 %687 }
 0x555   : > { %691 = vst.msk [vmem:[#allocation2] sm:$0xf] %vm690_vm6, %v688_v48 }
 0x55c   : > { %v807_v0 = vpop.permute.xlu1 %806 }
 0x55d   : > { %810 = vst.msk [vmem:[#allocation2] sm:$0xf] %vm809_vm7, %v807_v0 }
 0x564   : > { %v811_v49 = vld [vmem:[#allocation2] sm:$0xf] }
 0x565   : > { %1130 = vmatmul.mubr.msk.bf16.vlgmr.msra.gmra.mrb[16].mxu1 %vm295_vm1, %v811_v49 }
 0x638   : > { %v870_v51 = vpop.f32.mrb[16].mxu1 }
 0x639   : > { %v871_v52 = vadd.f32 %v1034_v50, %v870_v51  ;;  %v1131_v53 = vpop.f32.mrb[17].mxu1 }
 0x63a   : > { %v873_v54 = vpop.f32.mrb[18].mxu1 }
 0x63b   : > { %v1132_v55 = vpop.f32.mrb[19].mxu1  ;;  %v876_v56 = vadd.f32 %v871_v52, %v1639_v3  ;;  %v1038_v3 = vld [vmem:[%s1779_s4 + $0x1] ss:$0 sm:$0xff] }
 0x63d   : > { %v877_v57 = vsel %vm295_vm1, %v876_v56, 0.0 }
 0x63e   : > { %878 = vadd.xlane.f32.xlu0 %v877_v57 }
 0x6cb   : > { %v879_v58 = vpop.xlane.xlu0 %878 }
 0x6cc   : > { %v881_v59 = vmul.f32 0.03125, %v879_v58 }
 0x6ce   : > { %v882_v60 = vsub.f32 %v876_v56, %v881_v59 }
 0x6d0   : > { %v883_v61 = vmul.f32 %v882_v60, %v882_v60 }
 0x6d2   : > { %v884_v62 = vsel %vm295_vm1, %v883_v61, 0.0 }
 0x6d3   : > { %885 = vadd.xlane.f32.xlu1 %v884_v62 }
 0x760   : > { %v886_v63 = vpop.xlane.xlu1 %885 }
 0x761   : > { %v887_v1 = vmul.f32 0.03125, %v886_v63 }
 0x763   : > { %v889_v2 = vadd.f32 1e-12, %v887_v1 }
 0x765   : > { %1238 = vrsqrt.f32 %v889_v2 }
 0x76f   : > { %v1239_v4 = vpop.eup %1238 }
 0x770   : > { %v891_v5 = vmul.f32 %v1239_v4, %v882_v60 }
 0x772   : > { %v896_v7 = vmul.f32 %v1038_v3, %v891_v5 }
 0x774   : > { %v902_v8 = vadd.f32 %v1039_v6, %v896_v7 }
 0x776   : > { %903 = vst.msk [vmem:[%s268_s15] sm:$0xff] %vm295_vm1, %v902_v8 }
 0x777   : > { %1339 = shalt.err (!%p1336_p2)
}
 0x778   : > { %s1340_s12 = scalar_lea.hbm %s1730_s17, 128  ;;  %s1344_s28 = scalar_lea.hbm %s1780_s5, 256 }
 0x779   : > { %p1341_p13 = scmp.ne.s32.totalorder %s1730_s17, %s1340_s12  ;;  %p1345_p4 = scmp.lt.u32.totalorder %s1730_s17, %s1780_s5 }
 0x77a   : > { %p1346_p5 = scmp.lt.u32.totalorder %s1344_s28, %s1340_s12  ;;  %p1348_p11 = scmp.lt.u32.totalorder %s1340_s12, %s1730_s17 }
 0x77b   : > { %p1342_p6 = pnand %p1341_p13, %p1794_p0 }
 0x77c   : > { %p1347_p8 = por %p1346_p5, %p1345_p4 }
 0x77d   : > { %p1343_p10 = pneg %p1342_p6 }
 0x77e   : > { %p1349_p1 = por %p1348_p11, %p1347_p8 }
 0x780   : > { %p1350_p3 = pnand %p1349_p1, %p1343_p10 }
 0x782   : > { %1353 = shalt.err (!%p1350_p3)
}
 0x783   : > { %1143 = dma.vmem_to_hbm [thread:$0]  (%p1794_p0), %s1732_s16, 128, %s1730_s17, %s905_s24  }
 0x784 PF: > { %s930_s30 = sand.u32 1, %s1384_s18   ;;  %p1795_p7 = scmp.ne.s32.totalorder %s1785_s25, 0 }
 0x785   : > { %p1796_p9 = scmp.ge.s32.totalorder %s1396_s21, 2  ;;  %s931_s15 = scalar_lea.sflag [#allocation5], %s930_s30 }
 0x787   : > { %p1157_p12 = pnand %p1796_p9, %p1795_p7 }
 0x789   : > { %1379 = dma.done.wait (!%p1157_p12), %s931_s15, 128  }
 0x78a   : > { %1381 = vsyncadd (!%p1157_p12), %s931_s15, 4294967168  ;;  %p19_p2 = scmp.ge.s32.totalorder %s1560_s14, 4   ;;  %s1797_s18 = smov %s1388_s19 }
 0x78b   : > { %s1798_s19 = smov %s1392_s20  ;;  %s1799_s20 = smov %s1576_s27 }
 0x78c   : > { %s1800_s21 = smov %s1560_s14  ;;  %21 = sbr.rel (!%p19_p2) target bundleno = 6 (0x6), region = 93 }
 0x793   :  { %936 = vsyncpa [#allocation4], 1 }
 0x794   :  { %938 = vsyncpa [#allocation4 + $0x1], 1 }
 0x795   :  { %939 = vsyncpa [#allocation7], 1 }
 0x796   :  { %940 = vsyncpa [#allocation5], 1 }
 0x797   :  { %942 = vsyncpa [#allocation5 + $0x1], 1 }

</bundles_post_ra>
